<compile_context>
chip_gen: v7x
topology: tpu7x:2x2x1
jax: 0.10.0
libtpu: 0.0.40
codegen_flags: <defaults>
</compile_context>

<pallas_src>
import jax
import jax.numpy as jnp
from jax.experimental import pallas as pl
from jax.experimental.pallas import tpu as pltpu

LANE = 128


def _round_up(n, m):
    return ((n + m - 1) // m) * m


def _pad_axis(x, axis, target):
    pad = target - x.shape[axis]
    if pad <= 0:
        return x
    widths = [(0, 0)] * x.ndim
    widths[axis] = (0, pad)
    return jnp.pad(x, widths)


def _surname_kernel(x_ref, len_ref, wih_ref, whh_ref, brnn_ref,
                    w1_ref, b1_ref, w2_ref, b2_ref, logits_ref):
    """Fused SurnameClassifier forward; single invocation, everything VMEM/vreg-resident.

    x_ref   : (S*B, Fp)  time-major flattened embedded input (lane-padded f32)
    len_ref : (B, 1)     int32 sequence lengths
    wih_ref : (Fp, Hp)   W_ih^T      whh_ref : (Hp, Hp)  W_hh^T
    brnn_ref: (1, Hp)    b_ih + b_hh
    w1_ref  : (Hp, Hp)   fc1 W^T     b1_ref  : (1, Hp)
    w2_ref  : (Hp, Cp)   fc2 W^T     b2_ref  : (1, Cp)
    logits_ref : (B, Cp) output (lane-dense)
    """
    B = len_ref.shape[0]
    Hp = whh_ref.shape[0]
    S = x_ref.shape[0] // B

    # Phase 1 (off the serial path): input projection for ALL timesteps as one MXU
    # matmul, RNN bias folded in once.  Kept as a value (no VMEM scratch).
    pre = (jnp.dot(x_ref[...], wih_ref[...], preferred_element_type=jnp.float32)
           + brnn_ref[...])                                        # (S*B, Hp)

    # column_gather target per row; clamp length==0 to the last timestep
    # (PyTorch's y[:, -1] negative-index wrap-around).
    len_m1 = len_ref[...] - 1                                      # (B, 1) int32
    tgt = jnp.where(len_m1 < 0, S - 1, len_m1)

    whh = whh_ref[...]                                             # loop-invariant

    # Phase 2: serial Elman recurrence, fully unrolled with concrete t so every
    # slice of `pre` is static (one aligned (8,128) tile per step).  Hidden state
    # and the on-the-fly column_gather accumulator live in vregs.
    h = jnp.zeros((B, Hp), jnp.float32)        # initial hidden: zeros (module default)
    gathered = jnp.zeros((B, Hp), jnp.float32)
    for t in range(S):
        pre_t = pre[t * B:(t + 1) * B, :]                          # static slice
        h = jnp.tanh(pre_t + jnp.dot(h, whh, preferred_element_type=jnp.float32))
        gathered = jnp.where(tgt == t, h, gathered)

    # Phase 3: classifier head, relu(fc1) -> fc2 (dropout = identity, see TODO).
    z1 = jnp.dot(gathered, w1_ref[...], preferred_element_type=jnp.float32) + b1_ref[...]
    z1 = jnp.maximum(z1, 0.0)
    logits_ref[...] = (
        jnp.dot(z1, w2_ref[...], preferred_element_type=jnp.float32) + b2_ref[...]
    )


def prepare_params(emb, w_ih, w_hh, b_ih, b_hh, w1, b1, w2, b2):
    """One-time (model-load) parameter prep: lane-pad + transpose + cast.

    The embedding table is padded here so the per-call gather directly produces
    the lane-dense slab; all weights are pre-transposed/padded f32 so the forward
    call issues no per-call pad/transpose XLA ops.
    """
    E = emb.shape[1]
    H = w_ih.shape[0]
    C = w2.shape[0]
    Fp = _round_up(E, LANE)
    Hp = _round_up(H, LANE)
    Cp = _round_up(C, LANE)
    return {
        "emb_p": _pad_axis(emb.astype(jnp.float32), 1, Fp),                        # (V, Fp)
        "wih_t": _pad_axis(_pad_axis(w_ih.T.astype(jnp.float32), 0, Fp), 1, Hp),   # (Fp, Hp)
        "whh_t": _pad_axis(_pad_axis(w_hh.T.astype(jnp.float32), 0, Hp), 1, Hp),   # (Hp, Hp)
        "b_rnn": _pad_axis((b_ih + b_hh).astype(jnp.float32).reshape(1, H), 1, Hp),
        "w1_t": _pad_axis(_pad_axis(w1.T.astype(jnp.float32), 0, Hp), 1, Hp),
        "b1_p": _pad_axis(b1.astype(jnp.float32).reshape(1, H), 1, Hp),
        "w2_t": _pad_axis(_pad_axis(w2.T.astype(jnp.float32), 0, Hp), 1, Cp),
        "b2_p": _pad_axis(b2.astype(jnp.float32).reshape(1, C), 1, Cp),
    }


def surname_classifier_forward(tokens, x_lengths, params, num_classes,
                               apply_activator=False):
    """Pallas forward of SurnameClassifier (batch_first=True semantics).

    tokens:      (B, S) int32 token ids (padding_idx = 0)
    x_lengths:   (B,) int sequence lengths, or None -> use last timestep
    params:      output of prepare_params (padded/transposed f32 weights)
    num_classes: C (static Python int; used to slice off lane padding)
    Returns logits (B, C); softmax applied if apply_activator.
    """
    B, S = tokens.shape
    emb_p = params["emb_p"]
    Cp = params["w2_t"].shape[1]

    # Single gather emits the time-major, lane-padded (S*B, Fp) slab directly.
    x_p = jnp.take(emb_p, tokens.T.reshape(-1), axis=0)            # (S*B, Fp)

    if x_lengths is None:
        lens = jnp.full((B, 1), S, jnp.int32)
    else:
        lens = x_lengths.astype(jnp.int32).reshape(B, 1)

    vmem = pltpu.MemorySpace.VMEM
    logits_p = pl.pallas_call(
        _surname_kernel,
        out_shape=jax.ShapeDtypeStruct((B, Cp), jnp.float32),
        in_specs=[pl.BlockSpec(memory_space=vmem)] * 9,
        out_specs=pl.BlockSpec(memory_space=vmem),
        compiler_params=pltpu.CompilerParams(
            # Explicit scoped-VMEM budget (matters on v5e's 16 MiB / v7x's 32 MiB
            # defaults once S*B grows; trivially satisfied at demo sizes).
            vmem_limit_bytes=32 * 1024 * 1024),
    )(x_p, lens, params["wih_t"], params["whh_t"], params["b_rnn"],
      params["w1_t"], params["b1_p"], params["w2_t"], params["b2_p"])

    logits = logits_p[:, :num_classes]
    if apply_activator:
        logits = jax.nn.softmax(logits, axis=1)
    return logits


def _reference_forward(tokens, x_lengths, emb, w_ih, w_hh, b_ih, b_hh, w1, b1, w2, b2):
    """Pure-JAX reference of the PyTorch forward (dropout = identity)."""
    x = emb[tokens]                               # (B, S, E)
    B, S, _ = x.shape
    H = w_ih.shape[0]
    h = jnp.zeros((B, H), jnp.float32)
    hs = []
    for t in range(S):
        h = jnp.tanh(x[:, t, :] @ w_ih.T + b_ih + h @ w_hh.T + b_hh)
        hs.append(h)
    y = jnp.stack(hs, axis=1)                     # (B, S, H)
    if x_lengths is None:
        y_sel = y[:, -1, :]
    else:
        y_sel = y[jnp.arange(B), x_lengths - 1]   # column_gather
    z = jnp.maximum(y_sel @ w1.T + b1, 0.0)
    return z @ w2.T + b2


if __name__ == "__main__":
    # Small shapes consistent with the module.
    batch, seq, vocab, emb_dim, hidden, n_classes = 8, 8, 32, 32, 32, 16

    key = jax.random.PRNGKey(0)
    (k_emb, k_tok, k_len, k1, k2, k3, k4, k5, k6, k7, k8) = jax.random.split(key, 11)

    # Embedding table; row 0 is the padding_idx row (zeros), like nn.Embedding(padding_idx=0).
    emb = 0.1 * jax.random.normal(k_emb, (vocab, emb_dim), jnp.float32)
    emb = emb.at[0].set(0.0)

    bnd = 1.0 / jnp.sqrt(hidden)
    w_ih = jax.random.uniform(k1, (hidden, emb_dim), jnp.float32, -bnd, bnd)
    w_hh = jax.random.uniform(k2, (hidden, hidden), jnp.float32, -bnd, bnd)
    b_ih = jax.random.uniform(k3, (hidden,), jnp.float32, -bnd, bnd)
    b_hh = jax.random.uniform(k4, (hidden,), jnp.float32, -bnd, bnd)
    w1 = jax.random.uniform(k5, (hidden, hidden), jnp.float32, -bnd, bnd)
    b1 = jax.random.uniform(k6, (hidden,), jnp.float32, -bnd, bnd)
    w2 = jax.random.uniform(k7, (n_classes, hidden), jnp.float32, -bnd, bnd)
    b2 = jax.random.uniform(k8, (n_classes,), jnp.float32, -bnd, bnd)

    # Padded token sequences + per-row lengths (padding_idx = 0 beyond each length).
    lengths = jax.random.randint(k_len, (batch,), 1, seq + 1)
    tokens = jax.random.randint(k_tok, (batch, seq), 1, vocab)
    tokens = jnp.where(jnp.arange(seq)[None, :] < lengths[:, None], tokens, 0)

    # One-time (model-load) parameter prep — off the per-call path.
    params = prepare_params(emb, w_ih, w_hh, b_ih, b_hh, w1, b1, w2, b2)
    params = jax.block_until_ready(params)

    # Per-call path: gather + one pallas_call (jitted so the wrapper gather and
    # the kernel dispatch as a single program).
    fwd = jax.jit(surname_classifier_forward, static_argnums=(3, 4))
    out = fwd(tokens, lengths, params, n_classes, False)
    out = jax.block_until_ready(out)

    ref = _reference_forward(tokens, lengths, emb, w_ih, w_hh, b_ih, b_hh,
                             w1, b1, w2, b2)
    assert out.shape == (batch, n_classes)
    assert jnp.allclose(out, ref, atol=1e-4, rtol=1e-4), "mismatch vs reference"

    print("KERNEL_OK")
</pallas_src>

<mosaic_0001>
module attributes {stable_mosaic.version = 11 : i64} {
  func.func @_surname_kernel(%arg0: memref<64x128xf32, #tpu.memory_space<vmem>>, %arg1: memref<8x1xi32, #tpu.memory_space<vmem>>, %arg2: memref<128x128xf32, #tpu.memory_space<vmem>>, %arg3: memref<128x128xf32, #tpu.memory_space<vmem>>, %arg4: memref<1x128xf32, #tpu.memory_space<vmem>>, %arg5: memref<128x128xf32, #tpu.memory_space<vmem>>, %arg6: memref<1x128xf32, #tpu.memory_space<vmem>>, %arg7: memref<128x128xf32, #tpu.memory_space<vmem>>, %arg8: memref<1x128xf32, #tpu.memory_space<vmem>>, %arg9: memref<8x128xf32, #tpu.memory_space<vmem>>) attributes {dimension_semantics = [], scalar_prefetch = 0 : i64, scratch_operands = 0 : i64, tpu.core_type = #tpu.core_type<tc>} {
    %c0 = arith.constant 0 : index
    %c0_0 = arith.constant 0 : index
    %0 = vector.load %arg0[%c0, %c0_0] : memref<64x128xf32, #tpu.memory_space<vmem>>, vector<64x128xf32>
    %c0_1 = arith.constant 0 : index
    %c0_2 = arith.constant 0 : index
    %1 = vector.load %arg2[%c0_1, %c0_2] : memref<128x128xf32, #tpu.memory_space<vmem>>, vector<128x128xf32>
    %cst = arith.constant dense<0.000000e+00> : vector<64x128xf32>
    %2 = tpu.matmul %0, %1, %cst {dimension_numbers = #tpu.dot_dimension_numbers<[1], [0], [0], [1], [0, 0, 1, 1], [], []>} : vector<64x128xf32>, vector<128x128xf32>, vector<64x128xf32> -> vector<64x128xf32>
    %c0_3 = arith.constant 0 : index
    %c0_4 = arith.constant 0 : index
    %3 = vector.load %arg4[%c0_3, %c0_4] : memref<1x128xf32, #tpu.memory_space<vmem>>, vector<1x128xf32>
    %4 = vector.broadcast %3 : vector<1x128xf32> to vector<64x128xf32>
    %5 = arith.addf %2, %4 : vector<64x128xf32>
    %c0_5 = arith.constant 0 : index
    %c0_6 = arith.constant 0 : index
    %6 = vector.load %arg1[%c0_5, %c0_6] : memref<8x1xi32, #tpu.memory_space<vmem>>, vector<8x1xi32>
    %c1_i32 = arith.constant 1 : i32
    %7 = vector.broadcast %c1_i32 : i32 to vector<8x1xi32>
    %8 = arith.subi %6, %7 : vector<8x1xi32>
    %c0_i32 = arith.constant 0 : i32
    %9 = vector.broadcast %c0_i32 : i32 to vector<8x1xi32>
    %10 = arith.cmpi slt, %8, %9 : vector<8x1xi32>
    %c7_i32 = arith.constant 7 : i32
    %11 = vector.broadcast %c7_i32 : i32 to vector<8x1xi32>
    %12 = arith.select %10, %11, %8 : vector<8x1xi1>, vector<8x1xi32>
    %c0_7 = arith.constant 0 : index
    %c0_8 = arith.constant 0 : index
    %13 = vector.load %arg3[%c0_7, %c0_8] : memref<128x128xf32, #tpu.memory_space<vmem>>, vector<128x128xf32>
    %cst_9 = arith.constant 0.000000e+00 : f32
    %14 = vector.broadcast %cst_9 : f32 to vector<8x128xf32>
    %cst_10 = arith.constant 0.000000e+00 : f32
    %15 = vector.broadcast %cst_10 : f32 to vector<8x128xf32>
    %16 = vector.extract_strided_slice %5 {offsets = [0, 0], sizes = [8, 128], strides = [1, 1]} : vector<64x128xf32> to vector<8x128xf32>
    %cst_11 = arith.constant dense<0.000000e+00> : vector<8x128xf32>
    %17 = tpu.matmul %14, %13, %cst_11 {dimension_numbers = #tpu.dot_dimension_numbers<[1], [0], [0], [1], [0, 0, 1, 1], [], []>} : vector<8x128xf32>, vector<128x128xf32>, vector<8x128xf32> -> vector<8x128xf32>
    %18 = arith.addf %16, %17 : vector<8x128xf32>
    %19 = math.tanh %18 : vector<8x128xf32>
    %c0_i32_12 = arith.constant 0 : i32
    %20 = vector.broadcast %c0_i32_12 : i32 to vector<8x1xi32>
    %21 = arith.cmpi eq, %12, %20 : vector<8x1xi32>
    %22 = vector.shape_cast %21 : vector<8x1xi1> to vector<8x1xi1>
    %23 = vector.broadcast %22 : vector<8x1xi1> to vector<8x128xi1>
    %24 = arith.select %23, %19, %15 : vector<8x128xi1>, vector<8x128xf32>
    %25 = vector.extract_strided_slice %5 {offsets = [8, 0], sizes = [8, 128], strides = [1, 1]} : vector<64x128xf32> to vector<8x128xf32>
    %cst_13 = arith.constant dense<0.000000e+00> : vector<8x128xf32>
    %26 = tpu.matmul %19, %13, %cst_13 {dimension_numbers = #tpu.dot_dimension_numbers<[1], [0], [0], [1], [0, 0, 1, 1], [], []>} : vector<8x128xf32>, vector<128x128xf32>, vector<8x128xf32> -> vector<8x128xf32>
    %27 = arith.addf %25, %26 : vector<8x128xf32>
    %28 = math.tanh %27 : vector<8x128xf32>
    %c1_i32_14 = arith.constant 1 : i32
    %29 = vector.broadcast %c1_i32_14 : i32 to vector<8x1xi32>
    %30 = arith.cmpi eq, %12, %29 : vector<8x1xi32>
    %31 = vector.shape_cast %30 : vector<8x1xi1> to vector<8x1xi1>
    %32 = vector.broadcast %31 : vector<8x1xi1> to vector<8x128xi1>
    %33 = arith.select %32, %28, %24 : vector<8x128xi1>, vector<8x128xf32>
    %34 = vector.extract_strided_slice %5 {offsets = [16, 0], sizes = [8, 128], strides = [1, 1]} : vector<64x128xf32> to vector<8x128xf32>
    %cst_15 = arith.constant dense<0.000000e+00> : vector<8x128xf32>
    %35 = tpu.matmul %28, %13, %cst_15 {dimension_numbers = #tpu.dot_dimension_numbers<[1], [0], [0], [1], [0, 0, 1, 1], [], []>} : vector<8x128xf32>, vector<128x128xf32>, vector<8x128xf32> -> vector<8x128xf32>
    %36 = arith.addf %34, %35 : vector<8x128xf32>
    %37 = math.tanh %36 : vector<8x128xf32>
    %c2_i32 = arith.constant 2 : i32
    %38 = vector.broadcast %c2_i32 : i32 to vector<8x1xi32>
    %39 = arith.cmpi eq, %12, %38 : vector<8x1xi32>
    %40 = vector.shape_cast %39 : vector<8x1xi1> to vector<8x1xi1>
    %41 = vector.broadcast %40 : vector<8x1xi1> to vector<8x128xi1>
    %42 = arith.select %41, %37, %33 : vector<8x128xi1>, vector<8x128xf32>
    %43 = vector.extract_strided_slice %5 {offsets = [24, 0], sizes = [8, 128], strides = [1, 1]} : vector<64x128xf32> to vector<8x128xf32>
    %cst_16 = arith.constant dense<0.000000e+00> : vector<8x128xf32>
    %44 = tpu.matmul %37, %13, %cst_16 {dimension_numbers = #tpu.dot_dimension_numbers<[1], [0], [0], [1], [0, 0, 1, 1], [], []>} : vector<8x128xf32>, vector<128x128xf32>, vector<8x128xf32> -> vector<8x128xf32>
    %45 = arith.addf %43, %44 : vector<8x128xf32>
    %46 = math.tanh %45 : vector<8x128xf32>
    %c3_i32 = arith.constant 3 : i32
    %47 = vector.broadcast %c3_i32 : i32 to vector<8x1xi32>
    %48 = arith.cmpi eq, %12, %47 : vector<8x1xi32>
    %49 = vector.shape_cast %48 : vector<8x1xi1> to vector<8x1xi1>
    %50 = vector.broadcast %49 : vector<8x1xi1> to vector<8x128xi1>
    %51 = arith.select %50, %46, %42 : vector<8x128xi1>, vector<8x128xf32>
    %52 = vector.extract_strided_slice %5 {offsets = [32, 0], sizes = [8, 128], strides = [1, 1]} : vector<64x128xf32> to vector<8x128xf32>
    %cst_17 = arith.constant dense<0.000000e+00> : vector<8x128xf32>
    %53 = tpu.matmul %46, %13, %cst_17 {dimension_numbers = #tpu.dot_dimension_numbers<[1], [0], [0], [1], [0, 0, 1, 1], [], []>} : vector<8x128xf32>, vector<128x128xf32>, vector<8x128xf32> -> vector<8x128xf32>
    %54 = arith.addf %52, %53 : vector<8x128xf32>
    %55 = math.tanh %54 : vector<8x128xf32>
    %c4_i32 = arith.constant 4 : i32
    %56 = vector.broadcast %c4_i32 : i32 to vector<8x1xi32>
    %57 = arith.cmpi eq, %12, %56 : vector<8x1xi32>
    %58 = vector.shape_cast %57 : vector<8x1xi1> to vector<8x1xi1>
    %59 = vector.broadcast %58 : vector<8x1xi1> to vector<8x128xi1>
    %60 = arith.select %59, %55, %51 : vector<8x128xi1>, vector<8x128xf32>
    %61 = vector.extract_strided_slice %5 {offsets = [40, 0], sizes = [8, 128], strides = [1, 1]} : vector<64x128xf32> to vector<8x128xf32>
    %cst_18 = arith.constant dense<0.000000e+00> : vector<8x128xf32>
    %62 = tpu.matmul %55, %13, %cst_18 {dimension_numbers = #tpu.dot_dimension_numbers<[1], [0], [0], [1], [0, 0, 1, 1], [], []>} : vector<8x128xf32>, vector<128x128xf32>, vector<8x128xf32> -> vector<8x128xf32>
    %63 = arith.addf %61, %62 : vector<8x128xf32>
    %64 = math.tanh %63 : vector<8x128xf32>
    %c5_i32 = arith.constant 5 : i32
    %65 = vector.broadcast %c5_i32 : i32 to vector<8x1xi32>
    %66 = arith.cmpi eq, %12, %65 : vector<8x1xi32>
    %67 = vector.shape_cast %66 : vector<8x1xi1> to vector<8x1xi1>
    %68 = vector.broadcast %67 : vector<8x1xi1> to vector<8x128xi1>
    %69 = arith.select %68, %64, %60 : vector<8x128xi1>, vector<8x128xf32>
    %70 = vector.extract_strided_slice %5 {offsets = [48, 0], sizes = [8, 128], strides = [1, 1]} : vector<64x128xf32> to vector<8x128xf32>
    %cst_19 = arith.constant dense<0.000000e+00> : vector<8x128xf32>
    %71 = tpu.matmul %64, %13, %cst_19 {dimension_numbers = #tpu.dot_dimension_numbers<[1], [0], [0], [1], [0, 0, 1, 1], [], []>} : vector<8x128xf32>, vector<128x128xf32>, vector<8x128xf32> -> vector<8x128xf32>
    %72 = arith.addf %70, %71 : vector<8x128xf32>
    %73 = math.tanh %72 : vector<8x128xf32>
    %c6_i32 = arith.constant 6 : i32
    %74 = vector.broadcast %c6_i32 : i32 to vector<8x1xi32>
    %75 = arith.cmpi eq, %12, %74 : vector<8x1xi32>
    %76 = vector.shape_cast %75 : vector<8x1xi1> to vector<8x1xi1>
    %77 = vector.broadcast %76 : vector<8x1xi1> to vector<8x128xi1>
    %78 = arith.select %77, %73, %69 : vector<8x128xi1>, vector<8x128xf32>
    %79 = vector.extract_strided_slice %5 {offsets = [56, 0], sizes = [8, 128], strides = [1, 1]} : vector<64x128xf32> to vector<8x128xf32>
    %cst_20 = arith.constant dense<0.000000e+00> : vector<8x128xf32>
    %80 = tpu.matmul %73, %13, %cst_20 {dimension_numbers = #tpu.dot_dimension_numbers<[1], [0], [0], [1], [0, 0, 1, 1], [], []>} : vector<8x128xf32>, vector<128x128xf32>, vector<8x128xf32> -> vector<8x128xf32>
    %81 = arith.addf %79, %80 : vector<8x128xf32>
    %82 = math.tanh %81 : vector<8x128xf32>
    %c7_i32_21 = arith.constant 7 : i32
    %83 = vector.broadcast %c7_i32_21 : i32 to vector<8x1xi32>
    %84 = arith.cmpi eq, %12, %83 : vector<8x1xi32>
    %85 = vector.shape_cast %84 : vector<8x1xi1> to vector<8x1xi1>
    %86 = vector.broadcast %85 : vector<8x1xi1> to vector<8x128xi1>
    %87 = arith.select %86, %82, %78 : vector<8x128xi1>, vector<8x128xf32>
    %c0_22 = arith.constant 0 : index
    %c0_23 = arith.constant 0 : index
    %88 = vector.load %arg5[%c0_22, %c0_23] : memref<128x128xf32, #tpu.memory_space<vmem>>, vector<128x128xf32>
    %cst_24 = arith.constant dense<0.000000e+00> : vector<8x128xf32>
    %89 = tpu.matmul %87, %88, %cst_24 {dimension_numbers = #tpu.dot_dimension_numbers<[1], [0], [0], [1], [0, 0, 1, 1], [], []>} : vector<8x128xf32>, vector<128x128xf32>, vector<8x128xf32> -> vector<8x128xf32>
    %c0_25 = arith.constant 0 : index
    %c0_26 = arith.constant 0 : index
    %90 = vector.load %arg6[%c0_25, %c0_26] : memref<1x128xf32, #tpu.memory_space<vmem>>, vector<1x128xf32>
    %91 = vector.broadcast %90 : vector<1x128xf32> to vector<8x128xf32>
    %92 = arith.addf %89, %91 : vector<8x128xf32>
    %cst_27 = arith.constant 0.000000e+00 : f32
    %93 = vector.broadcast %cst_27 : f32 to vector<8x128xf32>
    %94 = arith.maximumf %92, %93 : vector<8x128xf32>
    %c0_28 = arith.constant 0 : index
    %c0_29 = arith.constant 0 : index
    %95 = vector.load %arg7[%c0_28, %c0_29] : memref<128x128xf32, #tpu.memory_space<vmem>>, vector<128x128xf32>
    %cst_30 = arith.constant dense<0.000000e+00> : vector<8x128xf32>
    %96 = tpu.matmul %94, %95, %cst_30 {dimension_numbers = #tpu.dot_dimension_numbers<[1], [0], [0], [1], [0, 0, 1, 1], [], []>} : vector<8x128xf32>, vector<128x128xf32>, vector<8x128xf32> -> vector<8x128xf32>
    %c0_31 = arith.constant 0 : index
    %c0_32 = arith.constant 0 : index
    %97 = vector.load %arg8[%c0_31, %c0_32] : memref<1x128xf32, #tpu.memory_space<vmem>>, vector<1x128xf32>
    %98 = vector.broadcast %97 : vector<1x128xf32> to vector<8x128xf32>
    %99 = arith.addf %96, %98 : vector<8x128xf32>
    %c0_33 = arith.constant 0 : index
    %c0_34 = arith.constant 0 : index
    %100 = vector.load %arg9[%c0_33, %c0_34] : memref<8x128xf32, #tpu.memory_space<vmem>>, vector<8x128xf32>
    tpu.vector_store %arg9[%c0_33, %c0_34], %99 {strides = array<i32>} : memref<8x128xf32, #tpu.memory_space<vmem>>, vector<8x128xf32>,
    return
  }
}

</mosaic_0001>

<bundles_post_ra>
// kernel: surname_classifier_forward.1
= control target key start
LH: loop header
LB: loop body
LE: loop exit
PB: predicated region body
PF: predicated region fallthrough
CT: control target
= control target key end

     0   :  { %v1934_v4 = vmov 0.0|0.0   ;;  %vm1935_vm0 = vmmov 0   ;;  %v1936_v8 = vmov 0.0   ;;  %v1937_v14 = vmov 0   ;;  %s2458_s0 = inlined_call_operand.vmem [shape: f32[64,128], index: 0, kind: input, shape index: {}]   ;;  %s2459_s1 = inlined_call_operand.vmem [shape: s32[8,1], index: 1, kind: input, shape index: {}]   ;;  %s2460_s2 = inlined_call_operand.vmem [shape: f32[128,128], index: 2, kind: input, shape index: {}]   ;;  %s2461_s3 = inlined_call_operand.vmem [shape: f32[128,128], index: 3, kind: input, shape index: {}]   ;;  %s2462_s4 = inlined_call_operand.vmem [shape: f32[1,128], index: 4, kind: input, shape index: {}]   ;;  %s2463_s5 = inlined_call_operand.vmem [shape: f32[128,128], index: 5, kind: input, shape index: {}]   ;;  %s2464_s6 = inlined_call_operand.vmem [shape: f32[1,128], index: 6, kind: input, shape index: {}]   ;;  %s2465_s7 = inlined_call_operand.vmem [shape: f32[128,128], index: 7, kind: input, shape index: {}]   ;;  %s2466_s8 = inlined_call_operand.vmem [shape: f32[1,128], index: 8, kind: input, shape index: {}]   ;;  %s2467_s9 = inlined_call_operand.hbm [shape: f32[8,128], index: 9, kind: output, shape index: {}]  }
   0x1   :  { %v41_v0 = vld [vmem:[%s2460_s2] sm:$0xff]  ;;  %v42_v1 = vld [vmem:[%s2460_s2 + $0x8] sm:$0xff]  ;;  %1647 = vmatprep.subr.bf16.mxu1 %v1934_v4  ;;  %v43_v6 = vld [vmem:[%s2460_s2 + $0x10] sm:$0xff]  ;;  %1297 = vmatprep.mubr.msk.f32.mxu1 %vm1935_vm0, %v1936_v8 }
   0x2   :  { %v173_v2 = vld [vmem:[%s2461_s3] sm:$0xff]  ;;  %v1615_v3 = vpack.c.bf16 %v42_v1, %v41_v0  ;;  %v174_v5 = vld [vmem:[%s2461_s3 + $0x8] sm:$0xff]  ;;  %v44_v7 = vld [vmem:[%s2460_s2 + $0x18] sm:$0xff]  ;;  %1892 = vset.pattern.permute.xlu0 %v1937_v14  ;;  %1893 = vset.pattern.permute.xlu1 %v1937_v14 }
   0x3   :  { %v2010_v9 = vpack.c.bf16 %v174_v5, %v173_v2  ;;  %v1619_v10 = vpack.c.bf16 %v44_v7, %v43_v6  ;;  %v175_v11 = vld [vmem:[%s2461_s3 + $0x10] sm:$0xff]  ;;  %v176_v12 = vld [vmem:[%s2461_s3 + $0x18] sm:$0xff]  ;;  %v45_v13 = vld [vmem:[%s2460_s2 + $0x20] sm:$0xff] }
   0x4   :  { %1616 = vmatprep.subr.bf16.mxu0 %v1615_v3  ;;  %v46_v15 = vld [vmem:[%s2460_s2 + $0x28] sm:$0xff]  ;;  %v2027_v16 = vpack.c.bf16 %v176_v12, %v175_v11  ;;  %v177_v18 = vld [vmem:[%s2461_s3 + $0x20] sm:$0xff]  ;;  %v47_v20 = vld [vmem:[%s2460_s2 + $0x30] sm:$0xff] }
   0x5   :  { %1618 = vmatpush3.bf16.msra.mxu0 %v1615_v3  ;;  %1649 = vmatpush3.bf16.msra.mxu1 %v2010_v9  ;;  %v1623_v17 = vpack.c.bf16 %v46_v15, %v45_v13  ;;  %v178_v19 = vld [vmem:[%s2461_s3 + $0x28] sm:$0xff]  ;;  %v48_v21 = vld [vmem:[%s2460_s2 + $0x38] sm:$0xff]  ;;  %v179_v24 = vld [vmem:[%s2461_s3 + $0x30] sm:$0xff] }
   0x6   :  { %1620 = vmatprep.subr.bf16.mxu0 %v1619_v10  ;;  %1650 = vmatprep.subr.bf16.mxu1 %v1934_v4  ;;  %v2043_v22 = vpack.c.bf16 %v178_v19, %v177_v18  ;;  %v1627_v23 = vpack.c.bf16 %v48_v21, %v47_v20  ;;  %v180_v25 = vld [vmem:[%s2461_s3 + $0x38] sm:$0xff]  ;;  %v49_v26 = vld [vmem:[%s2460_s2 + $0x40] sm:$0xff]  ;;  %v50_v27 = vld [vmem:[%s2460_s2 + $0x48] sm:$0xff] }
   0x7   :  { %v33_v28 = vld [vmem:[%s2458_s0] sm:$0xff] }
   0x8   :  { %1253 = vmatprep.mubr.f32.mxu0 %v33_v28  ;;  %v169_v29 = vld [vmem:[%s2459_s1] sm:$0xff] }
   0x9   :  { %1622 = vmatpush3.bf16.msra.mxu0 %v1619_v10  ;;  %1652 = vmatpush3.bf16.msra.mxu1 %v2027_v16 }
   0xa   :  { %1624 = vmatprep.subr.bf16.mxu0 %v1623_v17  ;;  %1653 = vmatprep.subr.bf16.mxu1 %v1934_v4 }
   0xb   :  { %14 = vsyncpa [#allocation3], 0  ;;  %v2065_v30 = vpack.c.bf16 %v180_v25, %v179_v24  ;;  %v1024_v31 = vadd.s32 4294967295, %v169_v29  ;;  %v1631_v32 = vpack.c.bf16 %v50_v27, %v49_v26  ;;  %v181_v33 = vld [vmem:[%s2461_s3 + $0x40] sm:$0xff]  ;;  %v182_v34 = vld [vmem:[%s2461_s3 + $0x48] sm:$0xff]  ;;  %s1938_s14 = smov [#allocation2]  }
   0xc   :  { %v51_v35 = vld [vmem:[%s2460_s2 + $0x50] sm:$0xff]  ;;  %v52_v36 = vld [vmem:[%s2460_s2 + $0x58] sm:$0xff]  ;;  %v2083_v38 = vpack.c.bf16 %v182_v34, %v181_v33  ;;  %v53_v43 = vld [vmem:[%s2460_s2 + $0x60] sm:$0xff]  ;;  %s1015_s15 = sshll.u32 %s1938_s14, 4  ;;  %s1016_s15 = int_to_ptr.vmem [resolvable:$true] %s1015_s15 }
   0xd   :  { %1626 = vmatpush3.bf16.msra.mxu0 %v1623_v17  ;;  %1655 = vmatpush3.bf16.msra.mxu1 %v2043_v22  ;;  %vm171_vm1 = vcmp.lt.s32.totalorder %v1024_v31, 0  ;;  %v1635_v39 = vpack.c.bf16 %v52_v36, %v51_v35  ;;  %v183_v40 = vld [vmem:[%s2461_s3 + $0x50] sm:$0xff]  ;;  %v184_v41 = vld [vmem:[%s2461_s3 + $0x58] sm:$0xff]  ;;  %v54_v44 = vld [vmem:[%s2460_s2 + $0x68] sm:$0xff]  ;;  %p1915_p1 = scmp.lt.s32.totalorder %s1016_s15, %s1016_s15 }
   0xe   :  { %1628 = vmatprep.subr.bf16.mxu0 %v1627_v23  ;;  %1656 = vmatprep.subr.bf16.mxu1 %v1934_v4  ;;  %v2080_v37 = vsel %vm171_vm1, 7, %v1024_v31  ;;  %v2101_v45 = vpack.c.bf16 %v184_v41, %v183_v40  ;;  %v1639_v46 = vpack.c.bf16 %v54_v44, %v53_v43  ;;  %v185_v47 = vld [vmem:[%s2461_s3 + $0x60] sm:$0xff]  ;;  %v186_v48 = vld [vmem:[%s2461_s3 + $0x68] sm:$0xff]  ;;  %v55_v49 = vld [vmem:[%s2460_s2 + $0x70] sm:$0xff] }
   0xf   :  { %vm261_vm2 = vcmp.eq.s32.totalorder %v2080_v37, 0  ;;  %v56_v50 = vld [vmem:[%s2460_s2 + $0x78] sm:$0xff]  ;;  %v2117_v51 = vpack.c.bf16 %v186_v48, %v185_v47  ;;  %v187_v53 = vld [vmem:[%s2461_s3 + $0x70] sm:$0xff]  ;;  %v34_v56 = vld [vmem:[%s2458_s0 + $0x8] sm:$0xff]  ;;  %vm340_vm3 = vcmp.eq.s32.totalorder %v2080_v37, 1  ;;  %vm419_vm4 = vcmp.eq.s32.totalorder %v2080_v37, 2 }
  0x10   :  { %v262_v42 = vsel %vm261_vm2, 1, %v1937_v14  ;;  %v1643_v52 = vpack.c.bf16 %v56_v50, %v55_v49  ;;  %v188_v54 = vld [vmem:[%s2461_s3 + $0x78] sm:$0xff]  ;;  %v35_v57 = vld [vmem:[%s2458_s0 + $0x10] sm:$0xff]  ;;  %v37_v59 = vld [vmem:[%s2458_s0 + $0x20] sm:$0xff]  ;;  %v341_v63 = vsel %vm340_vm3, 1, %v1937_v14  ;;  %v420_v19 = vsel %vm419_vm4, 1, %v1937_v14 }
  0x11   :  { %1630 = vmatpush3.bf16.msra.mxu0 %v1627_v23  ;;  %1658 = vmatpush3.bf16.msra.mxu1 %v2065_v30  ;;  %v2127_v55 = vpack.c.bf16 %v188_v54, %v187_v53  ;;  %v36_v58 = vld [vmem:[%s2458_s0 + $0x18] sm:$0xff]  ;;  %v38_v60 = vld [vmem:[%s2458_s0 + $0x28] sm:$0xff]  ;;  %v39_v61 = vld [vmem:[%s2458_s0 + $0x30] sm:$0xff]  ;;  %vm498_vm7 = vcmp.eq.s32.totalorder %v2080_v37, 3  ;;  %vm577_vm9 = vcmp.eq.s32.totalorder %v2080_v37, 4  ;;  %vm656_vm11 = vcmp.eq.s32.totalorder %v2080_v37, 5 }
  0x12   :  { %1632 = vmatprep.subr.bf16.mxu0 %v1631_v32  ;;  %1659 = vmatprep.subr.bf16.mxu1 %v1934_v4  ;;  %v40_v62 = vld [vmem:[%s2458_s0 + $0x38] sm:$0xff]  ;;  %v2196_v0 = vld [vmem:[%s2462_s4] ss:$0 sm:$0xff]  ;;  %v499_v31 = vsel %vm498_vm7, 1, %v1937_v14  ;;  %v578_v41 = vsel %vm577_vm9, 1, %v1937_v14  ;;  %v657_v50 = vsel %vm656_vm11, 1, %v1937_v14 }
  0x13   :  { %264 = vperm.xlu0 %1892, %v262_v42   ;;  %422 = vperm.xlu1 %1893, %v420_v19   ;;  %vm735_vm13 = vcmp.eq.s32.totalorder %v2080_v37, 6  ;;  %vm814_vm15 = vcmp.eq.s32.totalorder %v2080_v37, 7 }
  0x15   :  { %1634 = vmatpush3.bf16.msra.mxu0 %v1631_v32  ;;  %1661 = vmatpush3.bf16.msra.mxu1 %v2083_v38 }
  0x16   :  { %1636 = vmatprep.subr.bf16.mxu0 %v1635_v39  ;;  %1662 = vmatprep.subr.bf16.mxu1 %v1934_v4 }
  0x17   :  { %343 = vperm.xlu0 %1892, %v341_v63   ;;  %501 = vperm.xlu1 %1893, %v499_v31   ;;  %v815_v63 = vsel %vm814_vm15, 1, %v1937_v14  ;;  %v835_v31 = vld [vmem:[%s2463_s5 + $0x70] sm:$0xff] }
  0x19   :  { %1638 = vmatpush3.bf16.msra.mxu0 %v1635_v39  ;;  %1664 = vmatpush3.bf16.msra.mxu1 %v2101_v45 }
  0x1a   :  { %1640 = vmatprep.subr.bf16.mxu0 %v1639_v46  ;;  %1665 = vmatprep.subr.bf16.mxu1 %v1934_v4 }
  0x1b   :  { %580 = vperm.xlu0 %1892, %v578_v41   ;;  %659 = vperm.xlu1 %1893, %v657_v50   ;;  %v924_v50 = vld [vmem:[%s2465_s7 + $0x48] sm:$0xff] }
  0x1d   :  { %1642 = vmatpush3.bf16.msra.mxu0 %v1639_v46  ;;  %1667 = vmatpush3.bf16.msra.mxu1 %v2117_v51 }
  0x1e   :  { %1644 = vmatprep.subr.bf16.mxu0 %v1643_v52  ;;  %1668 = vmatprep.subr.bf16.mxu1 %v1934_v4 }
  0x1f   :  { %817 = vperm.xlu1 %1893, %v815_v63  }
  0x21   :  { %1646 = vmatpush3.bf16.msra.mxu0 %v1643_v52  ;;  %1670 = vmatpush3.bf16.msra.mxu1 %v2127_v55 }
  0x22   :  { %1671 = vmatprep.subr.bf16.mxu0 %v1934_v4  ;;  %1695 = vmatprep.subr.bf16.mxu1 %v1934_v4 }
  0x24   :  { %1254 = vmatmul.mubr.f32.vlgmr.msra.gmra.mrb[0].mxu0 %v34_v56  ;;  %1298 = vmatmul.mubr.f32.vlgmr.msra.gmra.mrb[0].mxu1 %v1936_v8 }
  0x25   :  { %1673 = vmatpush3.bf16.msra.mxu0 %v2010_v9  ;;  %1697 = vmatpush3.bf16.msra.mxu1 %v2010_v9 }
  0x26   :  { %1674 = vmatprep.subr.bf16.mxu0 %v1934_v4  ;;  %1698 = vmatprep.subr.bf16.mxu1 %v1934_v4 }
  0x27   :  { %1367 = vmatprep.mubr.msk.f32.mxu1 %vm1935_vm0, %v1936_v8  ;;  %1256 = vmatprep.mubr.f32.mxu0 %v35_v57 }
  0x28   :  { %1257 = vmatmul.mubr.f32.gmra.mrb[2].mxu0 %v36_v58 }
  0x29   :  { %1676 = vmatpush3.bf16.msra.mxu0 %v2027_v16  ;;  %1700 = vmatpush3.bf16.msra.mxu1 %v2027_v16 }
  0x2a   :  { %1677 = vmatprep.subr.bf16.mxu0 %v1934_v4  ;;  %1701 = vmatprep.subr.bf16.mxu1 %v1934_v4 }
  0x2b   :  { %1259 = vmatprep.mubr.f32.mxu0 %v37_v59 }
  0x2c   :  { %1260 = vmatmul.mubr.f32.gmra.mrb[4].mxu0 %v38_v60 }
  0x2d   :  { %1679 = vmatpush3.bf16.msra.mxu0 %v2043_v22  ;;  %1703 = vmatpush3.bf16.msra.mxu1 %v2043_v22 }
  0x2e   :  { %1680 = vmatprep.subr.bf16.mxu0 %v1934_v4  ;;  %1704 = vmatprep.subr.bf16.mxu1 %v1934_v4 }
  0x2f   :  { %1262 = vmatprep.mubr.f32.mxu0 %v39_v61  ;;  %v822_v61 = vld [vmem:[%s2463_s5 + $0x8] sm:$0xff] }
  0x30   :  { %1263 = vmatmul.mubr.f32.gmra.mrb[6].mxu0 %v40_v62  ;;  %v823_v62 = vld [vmem:[%s2463_s5 + $0x10] sm:$0xff] }
  0x31   :  { %1682 = vmatpush3.bf16.msra.mxu0 %v2065_v30  ;;  %1706 = vmatpush3.bf16.msra.mxu1 %v2065_v30 }
  0x32   :  { %1683 = vmatprep.subr.bf16.mxu0 %v1934_v4  ;;  %1707 = vmatprep.subr.bf16.mxu1 %v1934_v4 }
  0x33   :  { %1332 = vmatprep.mubr.msk.f32.mxu0 %vm1935_vm0, %v1936_v8 }
  0x35   :  { %1685 = vmatpush3.bf16.msra.mxu0 %v2083_v38  ;;  %1709 = vmatpush3.bf16.msra.mxu1 %v2083_v38 }
  0x36   :  { %1686 = vmatprep.subr.bf16.mxu0 %v1934_v4  ;;  %1710 = vmatprep.subr.bf16.mxu1 %v1934_v4 }
  0x39   :  { %1688 = vmatpush3.bf16.msra.mxu0 %v2101_v45  ;;  %1712 = vmatpush3.bf16.msra.mxu1 %v2101_v45 }
  0x3a   :  { %1689 = vmatprep.subr.bf16.mxu0 %v1934_v4  ;;  %1713 = vmatprep.subr.bf16.mxu1 %v1934_v4 }
  0x3d   :  { %1691 = vmatpush3.bf16.msra.mxu0 %v2117_v51  ;;  %1715 = vmatpush3.bf16.msra.mxu1 %v2117_v51 }
  0x3e   :  { %1692 = vmatprep.subr.bf16.mxu0 %v1934_v4  ;;  %1716 = vmatprep.subr.bf16.mxu1 %v1934_v4 }
  0x41   :  { %1694 = vmatpush3.bf16.msra.mxu0 %v2127_v55  ;;  %1718 = vmatpush3.bf16.msra.mxu1 %v2127_v55 }
  0x42   :  { %1719 = vmatprep.subr.bf16.mxu0 %v1934_v4  ;;  %1743 = vmatprep.subr.bf16.mxu1 %v1934_v4 }
  0x92   :  { %v265_v25 = vpop.permute.xlu0 %264  ;;  %v423_v36 = vpop.permute.xlu1 %422 }
  0x93   :  { %vm266_vm5 = vcmp.eq.s32.totalorder %v265_v25, 1  ;;  %vm424_vm8 = vcmp.eq.s32.totalorder %v423_v36, 1  ;;  %v831_v25 = vld [vmem:[%s2463_s5 + $0x50] sm:$0xff] }
  0x94   :  { %v917_v36 = vld [vmem:[%s2465_s7 + $0x10] sm:$0xff] }
  0x96   :  { %v344_v26 = vpop.permute.xlu0 %343  ;;  %v502_v47 = vpop.permute.xlu1 %501 }
  0x97   :  { %vm345_vm6 = vcmp.eq.s32.totalorder %v344_v26, 1  ;;  %vm503_vm10 = vcmp.eq.s32.totalorder %v502_v47, 1  ;;  %v922_v47 = vld [vmem:[%s2465_s7 + $0x38] sm:$0xff] }
  0x9a   :  { %v581_v57 = vpop.permute.xlu0 %580 }
  0x9b   :  { %vm582_vm12 = vcmp.eq.s32.totalorder %v581_v57, 1  ;;  %v927_v57 = vld [vmem:[%s2465_s7 + $0x60] sm:$0xff] }
  0xf7   :  { %v1255_v1 = vpop.f32.mrb[0].mxu0  ;;  %v255_v2 = vpop.f32.mrb[0].mxu1 }
  0xf8   :  { %v130_v3 = vpop.f32.mrb[1].mxu0  ;;  %v1299_v5 = vpop.f32.mrb[1].mxu1  ;;  %v136_v20 = vadd.f32 %v1255_v1, %v2196_v0 }
  0xf9   :  { %v131_v6 = vadd.f32 %v2196_v0, %v130_v3  ;;  %v825_v3 = vld [vmem:[%s2463_s5 + $0x20] sm:$0xff]  ;;  %v826_v5 = vld [vmem:[%s2463_s5 + $0x28] sm:$0xff] }
  0xfb   :  { %v259_v7 = vadd.f32 %v255_v2, %v131_v6  ;;  %v2217_v11 = vpop.f32.mrb[2].mxu0  ;;  %v824_v2 = vld [vmem:[%s2463_s5 + $0x18] sm:$0xff]  ;;  %v827_v6 = vld [vmem:[%s2463_s5 + $0x30] sm:$0xff] }
  0xfc   :  { %v140_v12 = vpop.f32.mrb[3].mxu0  ;;  %v146_v42 = vadd.f32 %v2217_v11, %v2196_v0  ;;  %v1843_v37 = vpack.c.bf16 %v824_v2, %v823_v62 }
  0xfd   :  { %1894 = vtanh.f32 %v259_v7  ;;  %v141_v32 = vadd.f32 %v2196_v0, %v140_v12  ;;  %v828_v7 = vld [vmem:[%s2463_s5 + $0x38] sm:$0xff] }
  0xff   :  { %v2219_v13 = vpop.f32.mrb[4].mxu0 }
 0x100   :  { %v2221_v15 = vpop.f32.mrb[5].mxu0 }
 0x101   :  { %v151_v52 = vadd.f32 %v2196_v0, %v2221_v15 }
 0x103   :  { %v2223_v17 = vpop.f32.mrb[6].mxu0 }
 0x104   :  { %v2225_v18 = vpop.f32.mrb[7].mxu0 }
 0x105   :  { %v161_v11 = vadd.f32 %v2196_v0, %v2225_v18  ;;  %v830_v18 = vld [vmem:[%s2463_s5 + $0x48] sm:$0xff] }
 0x107   :  { %v1895_v10 = vpop.eup %1894 }
 0x108   :  { %1333 = vmatmul.mubr.f32.vlgmr.msra.gmra.mrb[8].mxu0 %v1895_v10  ;;  %v267_v28 = vsel %vm266_vm5, %v1895_v10, 0.0  ;;  %v1849_v10 = vpack.c.bf16 %v828_v7, %v827_v6 }
 0x109   :  { %1721 = vmatpush3.bf16.msra.mxu0 %v2010_v9  ;;  %1402 = vmatprep.mubr.msk.f32.mxu0 %vm1935_vm0, %v1936_v8 }
 0x10a   :  { %1722 = vmatprep.subr.bf16.mxu0 %v1934_v4 }
 0x10d   :  { %1724 = vmatpush3.bf16.msra.mxu0 %v2027_v16 }
 0x10e   :  { %1725 = vmatprep.subr.bf16.mxu0 %v1934_v4 }
 0x111   :  { %1727 = vmatpush3.bf16.msra.mxu0 %v2043_v22 }
 0x112   :  { %1728 = vmatprep.subr.bf16.mxu0 %v1934_v4 }
 0x115   :  { %1730 = vmatpush3.bf16.msra.mxu0 %v2065_v30 }
 0x116   :  { %1731 = vmatprep.subr.bf16.mxu0 %v1934_v4 }
 0x119   :  { %1733 = vmatpush3.bf16.msra.mxu0 %v2083_v38 }
 0x11a   :  { %1734 = vmatprep.subr.bf16.mxu0 %v1934_v4 }
 0x11d   :  { %1736 = vmatpush3.bf16.msra.mxu0 %v2101_v45 }
 0x11e   :  { %1737 = vmatprep.subr.bf16.mxu0 %v1934_v4 }
 0x121   :  { %1739 = vmatpush3.bf16.msra.mxu0 %v2117_v51 }
 0x122   :  { %1740 = vmatprep.subr.bf16.mxu0 %v1934_v4 }
 0x125   :  { %1742 = vmatpush3.bf16.msra.mxu0 %v2127_v55 }
 0x126   :  { %1767 = vmatprep.subr.bf16.mxu0 %v1934_v4 }
 0x1db   :  { %v334_v21 = vpop.f32.mrb[8].mxu0 }
 0x1dc   :  { %v338_v23 = vadd.f32 %v334_v21, %v136_v20  ;;  %v1334_v24 = vpop.f32.mrb[9].mxu0 }
 0x1de   :  { %1896 = vtanh.f32 %v338_v23  ;;  %v829_v23 = vld [vmem:[%s2463_s5 + $0x40] sm:$0xff] }
 0x1df   :  { %v1852_v24 = vpack.c.bf16 %v830_v18, %v829_v23 }
 0x1e8   :  { %v1897_v27 = vpop.eup %1896 }
 0x1e9   :  { %v346_v29 = vsel %vm345_vm6, %v1897_v27, %v267_v28  ;;  %1368 = vmatmul.mubr.f32.vlgmr.msra.gmra.mrb[2].mxu1 %v1897_v27  ;;  %v833_v27 = vld [vmem:[%s2463_s5 + $0x60] sm:$0xff]  ;;  %v834_v28 = vld [vmem:[%s2463_s5 + $0x68] sm:$0xff] }
 0x1ea   :  { %1745 = vmatpush3.bf16.msra.mxu1 %v2010_v9  ;;  %1437 = vmatprep.mubr.msk.f32.mxu1 %vm1935_vm0, %v1936_v8 }
 0x1eb   :  { %1746 = vmatprep.subr.bf16.mxu1 %v1934_v4 }
 0x1ee   :  { %1748 = vmatpush3.bf16.msra.mxu1 %v2027_v16 }
 0x1ef   :  { %1749 = vmatprep.subr.bf16.mxu1 %v1934_v4 }
 0x1f2   :  { %1751 = vmatpush3.bf16.msra.mxu1 %v2043_v22 }
 0x1f3   :  { %1752 = vmatprep.subr.bf16.mxu1 %v1934_v4 }
 0x1f6   :  { %1754 = vmatpush3.bf16.msra.mxu1 %v2065_v30 }
 0x1f7   :  { %1755 = vmatprep.subr.bf16.mxu1 %v1934_v4 }
 0x1fa   :  { %1757 = vmatpush3.bf16.msra.mxu1 %v2083_v38 }
 0x1fb   :  { %1758 = vmatprep.subr.bf16.mxu1 %v1934_v4 }
 0x1fe   :  { %1760 = vmatpush3.bf16.msra.mxu1 %v2101_v45 }
 0x1ff   :  { %1761 = vmatprep.subr.bf16.mxu1 %v1934_v4 }
 0x202   :  { %1763 = vmatpush3.bf16.msra.mxu1 %v2117_v51 }
 0x203   :  { %1764 = vmatprep.subr.bf16.mxu1 %v1934_v4 }
 0x206   :  { %1766 = vmatpush3.bf16.msra.mxu1 %v2127_v55 }
 0x207   :  { %1791 = vmatprep.subr.bf16.mxu1 %v1934_v4 }
 0x2bc   :  { %v413_v33 = vpop.f32.mrb[2].mxu1 }
 0x2bd   :  { %v417_v34 = vadd.f32 %v413_v33, %v141_v32  ;;  %v1369_v35 = vpop.f32.mrb[3].mxu1  ;;  %v836_v32 = vld [vmem:[%s2463_s5 + $0x78] sm:$0xff] }
 0x2be   :  { %v1861_v33 = vpack.c.bf16 %v836_v32, %v835_v31  ;;  %v916_v35 = vld [vmem:[%s2465_s7 + $0x8] sm:$0xff] }
 0x2bf   :  { %1898 = vtanh.f32 %v417_v34  ;;  %v915_v34 = vld [vmem:[%s2465_s7] sm:$0xff] }
 0x2c9   :  { %v1899_v39 = vpop.eup %1898 }
 0x2ca   :  { %v425_v40 = vsel %vm424_vm8, %v1899_v39, %v346_v29  ;;  %1403 = vmatmul.mubr.f32.vlgmr.msra.gmra.mrb[10].mxu0 %v1899_v39  ;;  %v1858_v29 = vpack.c.bf16 %v834_v28, %v833_v27  ;;  %v1864_v39 = vpack.c.bf16 %v916_v35, %v915_v34 }
 0x2cb   :  { %1769 = vmatpush3.bf16.msra.mxu0 %v2010_v9  ;;  %1472 = vmatprep.mubr.msk.f32.mxu0 %vm1935_vm0, %v1936_v8 }
 0x2cc   :  { %1770 = vmatprep.subr.bf16.mxu0 %v1934_v4 }
 0x2cf   :  { %1772 = vmatpush3.bf16.msra.mxu0 %v2027_v16 }
 0x2d0   :  { %1773 = vmatprep.subr.bf16.mxu0 %v1934_v4 }
 0x2d3   :  { %1775 = vmatpush3.bf16.msra.mxu0 %v2043_v22 }
 0x2d4   :  { %1776 = vmatprep.subr.bf16.mxu0 %v1934_v4 }
 0x2d7   :  { %1778 = vmatpush3.bf16.msra.mxu0 %v2065_v30 }
 0x2d8   :  { %1779 = vmatprep.subr.bf16.mxu0 %v1934_v4 }
 0x2db   :  { %1781 = vmatpush3.bf16.msra.mxu0 %v2083_v38 }
 0x2dc   :  { %1782 = vmatprep.subr.bf16.mxu0 %v1934_v4 }
 0x2df   :  { %1784 = vmatpush3.bf16.msra.mxu0 %v2101_v45 }
 0x2e0   :  { %1785 = vmatprep.subr.bf16.mxu0 %v1934_v4 }
 0x2e3   :  { %1787 = vmatpush3.bf16.msra.mxu0 %v2117_v51 }
 0x2e4   :  { %1788 = vmatprep.subr.bf16.mxu0 %v1934_v4 }
 0x2e7   :  { %1790 = vmatpush3.bf16.msra.mxu0 %v2127_v55 }
 0x2e8   :  { %1815 = vmatprep.subr.bf16.mxu0 %v1934_v4 }
 0x39d   :  { %v492_v43 = vpop.f32.mrb[10].mxu0 }
 0x39e   :  { %v496_v44 = vadd.f32 %v492_v43, %v146_v42  ;;  %v1404_v46 = vpop.f32.mrb[11].mxu0  ;;  %v919_v42 = vld [vmem:[%s2465_s7 + $0x20] sm:$0xff]  ;;  %v920_v43 = vld [vmem:[%s2465_s7 + $0x28] sm:$0xff] }
 0x39f   :  { %v921_v46 = vld [vmem:[%s2465_s7 + $0x30] sm:$0xff] }
 0x3a0   :  { %1900 = vtanh.f32 %v496_v44  ;;  %v1870_v44 = vpack.c.bf16 %v920_v43, %v919_v42 }
 0x3aa   :  { %v1901_v48 = vpop.eup %1900 }
 0x3ab   :  { %v504_v49 = vsel %vm503_vm10, %v1901_v48, %v425_v40  ;;  %1438 = vmatmul.mubr.f32.vlgmr.msra.gmra.mrb[4].mxu1 %v1901_v48  ;;  %v918_v40 = vld [vmem:[%s2465_s7 + $0x18] sm:$0xff]  ;;  %v1873_v48 = vpack.c.bf16 %v922_v47, %v921_v46 }
 0x3ac   :  { %1793 = vmatpush3.bf16.msra.mxu1 %v2010_v9  ;;  %1507 = vmatprep.mubr.msk.f32.mxu1 %vm1935_vm0, %v1936_v8  ;;  %v1867_v41 = vpack.c.bf16 %v918_v40, %v917_v36 }
 0x3ad   :  { %1794 = vmatprep.subr.bf16.mxu1 %v1934_v4 }
 0x3b0   :  { %1796 = vmatpush3.bf16.msra.mxu1 %v2027_v16 }
 0x3b1   :  { %1797 = vmatprep.subr.bf16.mxu1 %v1934_v4 }
 0x3b4   :  { %1799 = vmatpush3.bf16.msra.mxu1 %v2043_v22 }
 0x3b5   :  { %1800 = vmatprep.subr.bf16.mxu1 %v1934_v4 }
 0x3b8   :  { %1802 = vmatpush3.bf16.msra.mxu1 %v2065_v30 }
 0x3b9   :  { %1803 = vmatprep.subr.bf16.mxu1 %v1934_v4 }
 0x3bc   :  { %1805 = vmatpush3.bf16.msra.mxu1 %v2083_v38 }
 0x3bd   :  { %1806 = vmatprep.subr.bf16.mxu1 %v1934_v4 }
 0x3c0   :  { %1808 = vmatpush3.bf16.msra.mxu1 %v2101_v45 }
 0x3c1   :  { %1809 = vmatprep.subr.bf16.mxu1 %v1934_v4 }
 0x3c4   :  { %1811 = vmatpush3.bf16.msra.mxu1 %v2117_v51 }
 0x3c5   :  { %1812 = vmatprep.subr.bf16.mxu1 %v1934_v4 }
 0x3c8   :  { %1814 = vmatpush3.bf16.msra.mxu1 %v2127_v55 }
 0x3c9   :  { %1839 = vmatprep.subr.bf16.mxu1 %v1934_v4 }
 0x47e   :  { %v571_v53 = vpop.f32.mrb[4].mxu1 }
 0x47f   :  { %v575_v54 = vadd.f32 %v571_v53, %v151_v52  ;;  %v1439_v56 = vpop.f32.mrb[5].mxu1  ;;  %v925_v53 = vld [vmem:[%s2465_s7 + $0x50] sm:$0xff] }
 0x481   :  { %1902 = vtanh.f32 %v575_v54  ;;  %v926_v54 = vld [vmem:[%s2465_s7 + $0x58] sm:$0xff] }
 0x482   :  { %v1879_v56 = vpack.c.bf16 %v926_v54, %v925_v53 }
 0x48b   :  { %v1903_v58 = vpop.eup %1902 }
 0x48c   :  { %v583_v59 = vsel %vm582_vm12, %v1903_v58, %v504_v49  ;;  %1473 = vmatmul.mubr.f32.vlgmr.msra.gmra.mrb[12].mxu0 %v1903_v58  ;;  %v923_v49 = vld [vmem:[%s2465_s7 + $0x40] sm:$0xff]  ;;  %v928_v58 = vld [vmem:[%s2465_s7 + $0x68] sm:$0xff] }
 0x48d   :  { %1817 = vmatpush3.bf16.msra.mxu0 %v2010_v9  ;;  %1542 = vmatprep.mubr.msk.f32.mxu0 %vm1935_vm0, %v1936_v8  ;;  %v736_v9 = vsel %vm735_vm13, 1, %v1937_v14  ;;  %v1846_v14 = vpack.c.bf16 %v826_v5, %v825_v3  ;;  %v1876_v52 = vpack.c.bf16 %v924_v50, %v923_v49 }
 0x48e   :  { %1818 = vmatprep.subr.bf16.mxu0 %v1934_v4  ;;  %738 = vperm.xlu0 %1892, %v736_v9   ;;  %v166_v9 = vadd.f32 %v2223_v17, %v2196_v0 }
 0x491   :  { %1820 = vmatpush3.bf16.msra.mxu0 %v2027_v16  ;;  %v156_v16 = vadd.f32 %v2219_v13, %v2196_v0  ;;  %v1025_v0 = vld [vmem:[%s2464_s6] ss:$0 sm:$0xff] }
 0x492   :  { %1821 = vmatprep.subr.bf16.mxu0 %v1934_v4 }
 0x495   :  { %1823 = vmatpush3.bf16.msra.mxu0 %v2043_v22 }
 0x496   :  { %1824 = vmatprep.subr.bf16.mxu0 %v1934_v4 }
 0x499   :  { %1826 = vmatpush3.bf16.msra.mxu0 %v2065_v30 }
 0x49a   :  { %1827 = vmatprep.subr.bf16.mxu0 %v1934_v4 }
 0x49d   :  { %1829 = vmatpush3.bf16.msra.mxu0 %v2083_v38 }
 0x49e   :  { %1830 = vmatprep.subr.bf16.mxu0 %v1934_v4 }
 0x4a1   :  { %1832 = vmatpush3.bf16.msra.mxu0 %v2101_v45  ;;  %v660_v45 = vpop.permute.xlu1 %659 }
 0x4a2   :  { %1833 = vmatprep.subr.bf16.mxu0 %v1934_v4  ;;  %vm661_vm14 = vcmp.eq.s32.totalorder %v660_v45, 1 }
 0x4a5   :  { %1835 = vmatpush3.bf16.msra.mxu0 %v2117_v51 }
 0x4a6   :  { %1836 = vmatprep.subr.bf16.mxu0 %v1934_v4 }
 0x4a9   :  { %1838 = vmatpush3.bf16.msra.mxu0 %v2127_v55  ;;  %v821_v55 = vld [vmem:[%s2463_s5] sm:$0xff] }
 0x4aa   :  { %1863 = vmatprep.subr.bf16.mxu0 %v1934_v4  ;;  %v1840_v1 = vpack.c.bf16 %v822_v61, %v821_v55 }
 0x50d   :  { %v739_v19 = vpop.permute.xlu0 %738 }
 0x50e   :  { %vm740_vm1 = vcmp.eq.s32.totalorder %v739_v19, 1 }
 0x55f   :  { %v650_v22 = vpop.f32.mrb[12].mxu0 }
 0x560   :  { %v654_v30 = vadd.f32 %v650_v22, %v156_v16  ;;  %v1474_v38 = vpop.f32.mrb[13].mxu0 }
 0x561   :  { %v818_v38 = vpop.permute.xlu1 %817 }
 0x562   :  { %1904 = vtanh.f32 %v654_v30 }
 0x56c   :  { %v1905_v51 = vpop.eup %1904 }
 0x56d   :  { %v662_v60 = vsel %vm661_vm14, %v1905_v51, %v583_v59  ;;  %1508 = vmatmul.mubr.f32.vlgmr.msra.gmra.mrb[6].mxu1 %v1905_v51  ;;  %v1882_v59 = vpack.c.bf16 %v928_v58, %v927_v57 }
 0x56e   :  { %1577 = vmatprep.mubr.msk.f32.mxu1 %vm1935_vm0, %v1936_v8  ;;  %1841 = vmatpush3.bf16.msra.mxu1 %v1840_v1  ;;  %v1026_v1 = vld [vmem:[%s2466_s8] ss:$0 sm:$0xff] }
 0x56f   :  { %1842 = vmatprep.subr.bf16.mxu1 %v1934_v4 }
 0x572   :  { %1844 = vmatpush3.bf16.msra.mxu1 %v1843_v37 }
 0x573   :  { %1845 = vmatprep.subr.bf16.mxu1 %v1934_v4 }
 0x576   :  { %1847 = vmatpush3.bf16.msra.mxu1 %v1846_v14 }
 0x577   :  { %1848 = vmatprep.subr.bf16.mxu1 %v1934_v4 }
 0x57a   :  { %1850 = vmatpush3.bf16.msra.mxu1 %v1849_v10 }
 0x57b   :  { %1851 = vmatprep.subr.bf16.mxu1 %v1934_v4 }
 0x57e   :  { %1853 = vmatpush3.bf16.msra.mxu1 %v1852_v24 }
 0x57f   :  { %1854 = vmatprep.subr.bf16.mxu1 %v1934_v4 }
 0x640   :  { %v729_v12 = vpop.f32.mrb[6].mxu1 }
 0x641   :  { %v733_v13 = vadd.f32 %v729_v12, %v161_v11  ;;  %v1509_v15 = vpop.f32.mrb[7].mxu1 }
 0x643   :  { %1906 = vtanh.f32 %v733_v13 }
 0x64d   :  { %v1907_v20 = vpop.eup %1906 }
 0x64e   :  { %v2351_v21 = vsel %vm740_vm1, %v1907_v20, %v662_v60  ;;  %1543 = vmatmul.mubr.f32.vlgmr.msra.gmra.mrb[14].mxu0 %v1907_v20  ;;  %v929_v60 = vld [vmem:[%s2465_s7 + $0x70] sm:$0xff] }
 0x64f   :  { %1612 = vmatprep.mubr.msk.f32.mxu0 %vm1935_vm0, %v1936_v8  ;;  %v832_v8 = vld [vmem:[%s2463_s5 + $0x58] sm:$0xff]  ;;  %1865 = vmatpush3.bf16.msra.mxu0 %v1864_v39  ;;  %vm819_vm0 = vcmp.eq.s32.totalorder %v818_v38, 1 }
 0x650   :  { %v1855_v26 = vpack.c.bf16 %v832_v8, %v831_v25  ;;  %1866 = vmatprep.subr.bf16.mxu0 %v1934_v4 }
 0x652   :  { %1856 = vmatpush3.bf16.msra.mxu1 %v1855_v26 }
 0x653   :  { %1857 = vmatprep.subr.bf16.mxu1 %v1934_v4  ;;  %1868 = vmatpush3.bf16.msra.mxu0 %v1867_v41 }
 0x654   :  { %1869 = vmatprep.subr.bf16.mxu0 %v1934_v4 }
 0x656   :  { %1859 = vmatpush3.bf16.msra.mxu1 %v1858_v29 }
 0x657   :  { %1860 = vmatprep.subr.bf16.mxu1 %v1934_v4  ;;  %1871 = vmatpush3.bf16.msra.mxu0 %v1870_v44 }
 0x658   :  { %1872 = vmatprep.subr.bf16.mxu0 %v1934_v4 }
 0x65a   :  { %1862 = vmatpush3.bf16.msra.mxu1 %v1861_v33 }
 0x65b   :  { %1874 = vmatpush3.bf16.msra.mxu0 %v1873_v48 }
 0x65c   :  { %1875 = vmatprep.subr.bf16.mxu0 %v1934_v4 }
 0x65f   :  { %1877 = vmatpush3.bf16.msra.mxu0 %v1876_v52 }
 0x660   :  { %1878 = vmatprep.subr.bf16.mxu0 %v1934_v4 }
 0x663   :  { %1880 = vmatpush3.bf16.msra.mxu0 %v1879_v56 }
 0x664   :  { %1881 = vmatprep.subr.bf16.mxu0 %v1934_v4 }
 0x667   :  { %1883 = vmatpush3.bf16.msra.mxu0 %v1882_v59 }
 0x668   :  { %1884 = vmatprep.subr.bf16.mxu0 %v1934_v4  ;;  %v930_v4 = vld [vmem:[%s2465_s7 + $0x78] sm:$0xff]  ;;  %s1910_s7 = scalar_lea.vmem %s1016_s15, 128 }
 0x669   :  { %v1885_v55 = vpack.c.bf16 %v930_v4, %v929_v60  ;;  %p1911_p0 = scmp.ne.s32.totalorder %s1016_s15, %s1910_s7  ;;  %p1916_p2 = scmp.lt.s32.totalorder %s1910_s7, %s1910_s7 }
 0x66b   :  { %1886 = vmatpush3.bf16.msra.mxu0 %v1885_v55  ;;  %p1917_p3 = por %p1916_p2, %p1915_p1 }
 0x66d   :  { %p1918_p4 = pnand %p1917_p3, %p1911_p0 }
 0x721   :  { %v808_v16 = vpop.f32.mrb[14].mxu0 }
 0x722   :  { %v812_v22 = vadd.f32 %v808_v16, %v166_v9  ;;  %v1544_v30 = vpop.f32.mrb[15].mxu0 }
 0x724   :  { %1908 = vtanh.f32 %v812_v22 }
 0x72e   :  { %v1909_v45 = vpop.eup %1908 }
 0x72f   :  { %v820_v51 = vsel %vm819_vm0, %v1909_v45, %v2351_v21 }
 0x730   :  { %1578 = vmatmul.mubr.f32.vlgmr.msra.gmra.mrb[8].mxu1 %v820_v51 }
 0x803   :  { %v910_v17 = vpop.f32.mrb[8].mxu1 }
 0x804   :  { %v911_v61 = vadd.f32 %v1025_v0, %v910_v17  ;;  %v1579_v62 = vpop.f32.mrb[9].mxu1 }
 0x806   :  { %v914_v63 = vmax.f32 %v911_v61, 0.0 }
 0x808   :  { %1613 = vmatmul.mubr.f32.vlgmr.msra.gmra.mrb[16].mxu0 %v914_v63 }
 0x8db   :  { %v1004_v2 = vpop.f32.mrb[16].mxu0 }
 0x8dc   :  { %v1005_v37 = vadd.f32 %v1026_v1, %v1004_v2  ;;  %v1614_v3 = vpop.f32.mrb[17].mxu0 }
 0x8de   :  { %1008 = vst [vmem:[#allocation2] sm:$0xff] %v1005_v37 }
 0x8df   :  { %1921 = shalt.err (!%p1918_p4)
}
 0x8e0   :  { %s1922_s17 = scalar_lea.hbm %s2467_s9, 128 }
 0x8e1   :  { %p1923_p5 = scmp.ne.s32.totalorder %s2467_s9, %s1922_s17  ;;  %p1926_p6 = scmp.lt.u32.totalorder %s1922_s17, %s2467_s9 }
 0x8e3   :  { %p1928_p7 = pnand %p1926_p6, %p1923_p5 }
 0x8e5   :  { %1931 = shalt.err (!%p1928_p7)
}
 0x8e6   :  { %1018 = dma.vmem_to_hbm [thread:$0]  %s1016_s15, 128, %s2467_s9, [#allocation3]  }
 0x8e7   :  { %1932 = dma.done.wait [#allocation3], 128  }
 0x8e8   :  { %1933 = vsyncadd [#allocation3], 4294967168 }
 0x8e9   :  { %1022 = vsyncpa [#allocation3], 1 }

</bundles_post_ra>
